<compile_context>
chip_gen: v5e
topology: v5e:2x2
jax: 0.10.0
libtpu: 0.0.40
codegen_flags: <defaults>
</compile_context>

<pallas_src>
import functools

import jax
import jax.numpy as jnp
from jax.experimental import pallas as pl
from jax.experimental.pallas import tpu as pltpu


def _round_up(a, m):
    return -(-a // m) * m


def _fusion_kernel(x_ref, c_ref, t_ref, wx_ref, wc_ref, wt_ref, b_ref,
                   out_ref, g1p_ref, g2p_ref, *, dim_out, tm, n_rows, masked):
    # One fused result: columns are [h1 | h2 | gate1_pre | gate2_pre].
    y = (jnp.dot(x_ref[...], wx_ref[...], preferred_element_type=jnp.float32)
         + jnp.dot(c_ref[...], wc_ref[...], preferred_element_type=jnp.float32)
         + jnp.dot(t_ref[...], wt_ref[...], preferred_element_type=jnp.float32)
         + b_ref[...])

    h1 = y[:, 0 * dim_out:1 * dim_out]
    h2 = y[:, 1 * dim_out:2 * dim_out]
    g1 = jax.nn.sigmoid(y[:, 2 * dim_out:3 * dim_out])
    g2 = jax.nn.sigmoid(y[:, 3 * dim_out:4 * dim_out])

    out_ref[...] = (h1 + h2 * g2).astype(out_ref.dtype)

    # Per-tile partial sums of the gates (padded rows masked out).
    if masked:
        row = (pl.program_id(0) * tm
               + jax.lax.broadcasted_iota(jnp.int32, (tm, dim_out), 0))
        valid = row < n_rows
        s1 = jnp.sum(jnp.where(valid, g1, 0.0))
        s2 = jnp.sum(jnp.where(valid, g2, 0.0))
    else:
        s1 = jnp.sum(g1)
        s2 = jnp.sum(g2)

    # Write lane-dense (1, 8, 128) blocks; reduced in the wrapper.
    g1p_ref[...] = jnp.broadcast_to(s1, g1p_ref.shape)
    g2p_ref[...] = jnp.broadcast_to(s2, g2p_ref.shape)


def adaptive_fusion_ver5_nogateed(ctx, x, timeemb, params, *, tm_max=256):
    """Returns (ret, gatex_mean, gatec_mean)."""
    assert ctx.shape[:-1] == x.shape[:-1] == timeemb.shape[:-1]
    lead_shape = x.shape[:-1]
    dim_in = x.shape[-1]
    dim_ctx = ctx.shape[-1]
    dim_time = timeemb.shape[-1]
    dim_out = params["w1"].shape[1]
    wdt = params["w1"].dtype

    w1, b1 = params["w1"], params["b1"]
    w2, b2 = params["w2"], params["b2"]
    wg1, bg1 = params["wg1"], params["bg1"]
    wg2, bg2 = params["wg2"], params["bg2"]

    # Pack weights per input stream; output columns = [h1 | h2 | gate1 | gate2].
    # hyper-gate weights are laid out for cat(x, ctx, timeemb); layer2 for
    # cat(ctx, timeemb).
    zx = jnp.zeros((dim_in, dim_out), wdt)
    zc = jnp.zeros((dim_ctx, dim_out), wdt)
    zt = jnp.zeros((dim_time, dim_out), wdt)
    wx = jnp.concatenate([w1, zx, wg1[:dim_in], wg2[:dim_in]], axis=1)
    wc = jnp.concatenate([zc, w2[:dim_ctx],
                          wg1[dim_in:dim_in + dim_ctx],
                          wg2[dim_in:dim_in + dim_ctx]], axis=1)
    wt = jnp.concatenate([zt, w2[dim_ctx:],
                          wg1[dim_in + dim_ctx:],
                          wg2[dim_in + dim_ctx:]], axis=1)
    bp = jnp.concatenate([b1, b2, bg1, bg2], axis=1)

    # Flatten leading dims to rows; pick a large row tile (multiple of 8).
    x2 = x.reshape(-1, dim_in)
    c2 = ctx.reshape(-1, dim_ctx)
    t2 = timeemb.reshape(-1, dim_time)
    n_rows = x2.shape[0]

    tm = tm_max if n_rows >= tm_max else _round_up(n_rows, 8)
    n_pad = _round_up(n_rows, tm)
    if n_pad != n_rows:
        pad = ((0, n_pad - n_rows), (0, 0))
        x2, c2, t2 = jnp.pad(x2, pad), jnp.pad(c2, pad), jnp.pad(t2, pad)
    n_tiles = n_pad // tm

    # Scoped-VMEM budget sized to the tile footprint (double buffered) + margin.
    per_step = 4 * (tm * (dim_in + dim_ctx + dim_time + dim_out)
                    + (dim_in + dim_ctx + dim_time + 1) * 4 * dim_out
                    + 2 * 8 * 128)
    vmem_limit = int(min(64 * 2 ** 20, max(16 * 2 ** 20, 4 * per_step)))

    kernel = functools.partial(_fusion_kernel, dim_out=dim_out, tm=tm,
                               n_rows=n_rows, masked=(n_pad != n_rows))

    out, g1p, g2p = pl.pallas_call(
        kernel,
        out_shape=(
            jax.ShapeDtypeStruct((n_pad, dim_out), x.dtype),
            jax.ShapeDtypeStruct((n_tiles, 8, 128), jnp.float32),
            jax.ShapeDtypeStruct((n_tiles, 8, 128), jnp.float32),
        ),
        grid_spec=pltpu.PrefetchScalarGridSpec(
            num_scalar_prefetch=0,
            grid=(n_tiles,),
            in_specs=[
                pl.BlockSpec((tm, dim_in), lambda i: (i, 0)),            # x rows
                pl.BlockSpec((tm, dim_ctx), lambda i: (i, 0)),           # ctx rows
                pl.BlockSpec((tm, dim_time), lambda i: (i, 0)),          # time rows
                pl.BlockSpec((dim_in, 4 * dim_out), lambda i: (0, 0)),   # Wx pack
                pl.BlockSpec((dim_ctx, 4 * dim_out), lambda i: (0, 0)),  # Wc pack
                pl.BlockSpec((dim_time, 4 * dim_out), lambda i: (0, 0)), # Wt pack
                pl.BlockSpec((1, 4 * dim_out), lambda i: (0, 0)),        # bias pack
            ],
            out_specs=(
                pl.BlockSpec((tm, dim_out), lambda i: (i, 0)),
                pl.BlockSpec((1, 8, 128), lambda i: (i, 0, 0)),
                pl.BlockSpec((1, 8, 128), lambda i: (i, 0, 0)),
            ),
        ),
        compiler_params=pltpu.CompilerParams(
            dimension_semantics=("parallel",),
            vmem_limit_bytes=vmem_limit),
    )(x2, c2, t2, wx, wc, wt, bp)

    inv_total = 1.0 / float(n_rows * dim_out)
    gatex_mean = (jnp.sum(g1p[:, 0, 0]) * inv_total).reshape(1)
    gatec_mean = (jnp.sum(g2p[:, 0, 0]) * inv_total).reshape(1)
    ret = out[:n_rows].reshape(*lead_shape, dim_out)
    return ret, gatex_mean, gatec_mean


def init_params(key, dim_in, dim_out, dim_ctx, dim_time=3, dtype=jnp.float32):
    """Deterministic synthetic init; weights stored as [in_features, out]."""
    ks = jax.random.split(key, 8)
    d_g = dim_in + dim_ctx + dim_time
    d_2 = dim_ctx + dim_time
    s1 = 1.0 / (dim_in ** 0.5)
    s2 = 1.0 / (d_2 ** 0.5)
    sg = 1.0 / (d_g ** 0.5)
    return {
        "w1": jax.random.uniform(ks[0], (dim_in, dim_out), dtype, -s1, s1),
        "b1": jax.random.uniform(ks[1], (1, dim_out), dtype, -s1, s1),
        "w2": jax.random.uniform(ks[2], (d_2, dim_out), dtype, -s2, s2),
        "b2": jax.random.uniform(ks[3], (1, dim_out), dtype, -s2, s2),
        "wg1": jax.random.uniform(ks[4], (d_g, dim_out), dtype, -sg, sg),
        "bg1": jax.random.uniform(ks[5], (1, dim_out), dtype, -sg, sg),
        "wg2": jax.random.uniform(ks[6], (d_g, dim_out), dtype, -sg, sg),
        "bg2": jax.random.uniform(ks[7], (1, dim_out), dtype, -sg, sg),
    }


def _reference(ctx, x, timeemb, params):
    in1 = jnp.concatenate((x, ctx, timeemb), axis=-1)
    ctx_t = jnp.concatenate((ctx, timeemb), axis=-1)
    g1 = jax.nn.sigmoid(in1 @ params["wg1"] + params["bg1"][0])
    g2 = jax.nn.sigmoid(in1 @ params["wg2"] + params["bg2"][0])
    ret = (x @ params["w1"] + params["b1"][0]
           + (ctx_t @ params["w2"] + params["b2"][0]) * g2)
    return ret, jnp.mean(g1).reshape(1), jnp.mean(g2).reshape(1)


if __name__ == "__main__":
    batch, seq = 2, 8
    dim_in, dim_out, dim_ctx, dim_time = 32, 32, 16, 3

    key = jax.random.PRNGKey(0)
    kp, kx, kc, kt = jax.random.split(key, 4)

    params = init_params(kp, dim_in, dim_out, dim_ctx, dim_time)
    x = jax.random.normal(kx, (batch, seq, dim_in), jnp.float32)
    ctx = jax.random.normal(kc, (batch, seq, dim_ctx), jnp.float32)
    timeemb = jax.random.normal(kt, (batch, seq, dim_time), jnp.float32)

    ret, gatex_mean, gatec_mean = adaptive_fusion_ver5_nogateed(
        ctx, x, timeemb, params)
    jax.block_until_ready((ret, gatex_mean, gatec_mean))

    ret_ref, gx_ref, gc_ref = _reference(ctx, x, timeemb, params)
    assert ret.shape == (batch, seq, dim_out)
    assert gatex_mean.shape == (1,) and gatec_mean.shape == (1,)
    assert jnp.allclose(ret, ret_ref, atol=1e-5, rtol=1e-5)
    assert jnp.allclose(gatex_mean, gx_ref, atol=1e-5, rtol=1e-5)
    assert jnp.allclose(gatec_mean, gc_ref, atol=1e-5, rtol=1e-5)

    print("KERNEL_OK")
</pallas_src>

<mosaic_0001>
module attributes {stable_mosaic.version = 11 : i64} {
  func.func @_fusion_kernel(%arg0: i32, %arg1: memref<16x32xf32, #tpu.memory_space<vmem>>, %arg2: memref<16x16xf32, #tpu.memory_space<vmem>>, %arg3: memref<16x3xf32, #tpu.memory_space<vmem>>, %arg4: memref<32x128xf32, #tpu.memory_space<vmem>>, %arg5: memref<16x128xf32, #tpu.memory_space<vmem>>, %arg6: memref<3x128xf32, #tpu.memory_space<vmem>>, %arg7: memref<1x128xf32, #tpu.memory_space<vmem>>, %arg8: memref<16x32xf32, #tpu.memory_space<vmem>>, %arg9: memref<1x8x128xf32, #tpu.memory_space<vmem>>, %arg10: memref<1x8x128xf32, #tpu.memory_space<vmem>>) attributes {dimension_semantics = [#tpu.dimension_semantics<parallel>], iteration_bounds = array<i64: 1>, scalar_prefetch = 0 : i64, scratch_operands = 0 : i64, tpu.core_type = #tpu.core_type<tc>, window_params = [{transform_indices = @transform_0, window_bounds = array<i64: 16, 32>}, {transform_indices = @transform_1, window_bounds = array<i64: 16, 16>}, {transform_indices = @transform_2, window_bounds = array<i64: 16, 3>}, {pipeline_mode = #tpu.pipeline_mode<synchronous>, transform_indices = @transform_3, window_bounds = array<i64: 32, 128>}, {pipeline_mode = #tpu.pipeline_mode<synchronous>, transform_indices = @transform_4, window_bounds = array<i64: 16, 128>}, {pipeline_mode = #tpu.pipeline_mode<synchronous>, transform_indices = @transform_5, window_bounds = array<i64: 3, 128>}, {pipeline_mode = #tpu.pipeline_mode<synchronous>, transform_indices = @transform_6, window_bounds = array<i64: 1, 128>}, {transform_indices = @transform_7, window_bounds = array<i64: 16, 32>}, {transform_indices = @transform_8, window_bounds = array<i64: 1, 8, 128>}, {transform_indices = @transform_9, window_bounds = array<i64: 1, 8, 128>}]} {
    %c0 = arith.constant 0 : index
    %c0_0 = arith.constant 0 : index
    %0 = vector.load %arg1[%c0, %c0_0] : memref<16x32xf32, #tpu.memory_space<vmem>>, vector<16x32xf32>
    %c0_1 = arith.constant 0 : index
    %c0_2 = arith.constant 0 : index
    %1 = vector.load %arg4[%c0_1, %c0_2] : memref<32x128xf32, #tpu.memory_space<vmem>>, vector<32x128xf32>
    %cst = arith.constant dense<0.000000e+00> : vector<16x128xf32>
    %2 = tpu.matmul %0, %1, %cst {dimension_numbers = #tpu.dot_dimension_numbers<[1], [0], [0], [1], [0, 0, 1, 1], [], []>} : vector<16x32xf32>, vector<32x128xf32>, vector<16x128xf32> -> vector<16x128xf32>
    %c0_3 = arith.constant 0 : index
    %c0_4 = arith.constant 0 : index
    %3 = vector.load %arg2[%c0_3, %c0_4] : memref<16x16xf32, #tpu.memory_space<vmem>>, vector<16x16xf32>
    %c0_5 = arith.constant 0 : index
    %c0_6 = arith.constant 0 : index
    %4 = vector.load %arg5[%c0_5, %c0_6] : memref<16x128xf32, #tpu.memory_space<vmem>>, vector<16x128xf32>
    %cst_7 = arith.constant dense<0.000000e+00> : vector<16x128xf32>
    %5 = tpu.matmul %3, %4, %cst_7 {dimension_numbers = #tpu.dot_dimension_numbers<[1], [0], [0], [1], [0, 0, 1, 1], [], []>} : vector<16x16xf32>, vector<16x128xf32>, vector<16x128xf32> -> vector<16x128xf32>
    %6 = arith.addf %2, %5 : vector<16x128xf32>
    %c0_8 = arith.constant 0 : index
    %c0_9 = arith.constant 0 : index
    %7 = vector.load %arg3[%c0_8, %c0_9] : memref<16x3xf32, #tpu.memory_space<vmem>>, vector<16x3xf32>
    %c0_10 = arith.constant 0 : index
    %c0_11 = arith.constant 0 : index
    %8 = vector.load %arg6[%c0_10, %c0_11] : memref<3x128xf32, #tpu.memory_space<vmem>>, vector<3x128xf32>
    %cst_12 = arith.constant dense<0.000000e+00> : vector<16x128xf32>
    %9 = tpu.matmul %7, %8, %cst_12 {dimension_numbers = #tpu.dot_dimension_numbers<[1], [0], [0], [1], [0, 0, 1, 1], [], []>} : vector<16x3xf32>, vector<3x128xf32>, vector<16x128xf32> -> vector<16x128xf32>
    %10 = arith.addf %6, %9 : vector<16x128xf32>
    %c0_13 = arith.constant 0 : index
    %c0_14 = arith.constant 0 : index
    %11 = vector.load %arg7[%c0_13, %c0_14] : memref<1x128xf32, #tpu.memory_space<vmem>>, vector<1x128xf32>
    %12 = vector.broadcast %11 : vector<1x128xf32> to vector<16x128xf32>
    %13 = arith.addf %10, %12 : vector<16x128xf32>
    %14 = vector.extract_strided_slice %13 {offsets = [0, 0], sizes = [16, 32], strides = [1, 1]} : vector<16x128xf32> to vector<16x32xf32>
    %15 = vector.extract_strided_slice %13 {offsets = [0, 32], sizes = [16, 32], strides = [1, 1]} : vector<16x128xf32> to vector<16x32xf32>
    %16 = vector.extract_strided_slice %13 {offsets = [0, 64], sizes = [16, 32], strides = [1, 1]} : vector<16x128xf32> to vector<16x32xf32>
    %17 = arith.negf %16 : vector<16x32xf32>
    %18 = math.exp %17 : vector<16x32xf32>
    %cst_15 = arith.constant 1.000000e+00 : f32
    %19 = vector.broadcast %cst_15 : f32 to vector<16x32xf32>
    %20 = arith.addf %19, %18 : vector<16x32xf32>
    %21 = arith.divf %19, %20 : vector<16x32xf32>
    %22 = vector.extract_strided_slice %13 {offsets = [0, 96], sizes = [16, 32], strides = [1, 1]} : vector<16x128xf32> to vector<16x32xf32>
    %23 = arith.negf %22 : vector<16x32xf32>
    %24 = math.exp %23 : vector<16x32xf32>
    %cst_16 = arith.constant 1.000000e+00 : f32
    %25 = vector.broadcast %cst_16 : f32 to vector<16x32xf32>
    %26 = arith.addf %25, %24 : vector<16x32xf32>
    %27 = arith.divf %25, %26 : vector<16x32xf32>
    %28 = arith.mulf %15, %27 : vector<16x32xf32>
    %29 = arith.addf %14, %28 : vector<16x32xf32>
    %c0_17 = arith.constant 0 : index
    %c0_18 = arith.constant 0 : index
    %30 = vector.load %arg8[%c0_17, %c0_18] : memref<16x32xf32, #tpu.memory_space<vmem>>, vector<16x32xf32>
    tpu.vector_store %arg8[%c0_17, %c0_18], %29 {strides = array<i32>} : memref<16x32xf32, #tpu.memory_space<vmem>>, vector<16x32xf32>,
    %31 = vector.shape_cast %21 : vector<16x32xf32> to vector<1x16x32xf32>
    %cst_19 = arith.constant dense<0.000000e+00> : vector<1xf32>
    %32 = vector.multi_reduction <add>, %31, %cst_19 [1, 2] : vector<1x16x32xf32> to vector<1xf32>
    %33 = vector.shape_cast %32 : vector<1xf32> to vector<1x1x1xf32>
    %34 = vector.extract %33[0, 0, 0] : f32 from vector<1x1x1xf32>
    %35 = vector.shape_cast %27 : vector<16x32xf32> to vector<1x16x32xf32>
    %cst_20 = arith.constant dense<0.000000e+00> : vector<1xf32>
    %36 = vector.multi_reduction <add>, %35, %cst_20 [1, 2] : vector<1x16x32xf32> to vector<1xf32>
    %37 = vector.shape_cast %36 : vector<1xf32> to vector<1x1x1xf32>
    %38 = vector.extract %37[0, 0, 0] : f32 from vector<1x1x1xf32>
    %39 = vector.broadcast %34 : f32 to vector<1x8x128xf32>
    %c0_21 = arith.constant 0 : index
    %c0_22 = arith.constant 0 : index
    %c0_23 = arith.constant 0 : index
    %40 = vector.load %arg9[%c0_21, %c0_22, %c0_23] : memref<1x8x128xf32, #tpu.memory_space<vmem>>, vector<1x8x128xf32>
    tpu.vector_store %arg9[%c0_21, %c0_22, %c0_23], %39 {strides = array<i32>} : memref<1x8x128xf32, #tpu.memory_space<vmem>>, vector<1x8x128xf32>,
    %41 = vector.broadcast %38 : f32 to vector<1x8x128xf32>
    %c0_24 = arith.constant 0 : index
    %c0_25 = arith.constant 0 : index
    %c0_26 = arith.constant 0 : index
    %42 = vector.load %arg10[%c0_24, %c0_25, %c0_26] : memref<1x8x128xf32, #tpu.memory_space<vmem>>, vector<1x8x128xf32>
    tpu.vector_store %arg10[%c0_24, %c0_25, %c0_26], %41 {strides = array<i32>} : memref<1x8x128xf32, #tpu.memory_space<vmem>>, vector<1x8x128xf32>,
    return
  }
  func.func @transform_0(%arg0: i32) -> (i32, i32) {
    %c0_i32 = arith.constant 0 : i32
    %c0_i32_0 = arith.constant 0 : i32
    return %arg0, %c0_i32 : i32, i32
  }
  func.func @transform_1(%arg0: i32) -> (i32, i32) {
    %c0_i32 = arith.constant 0 : i32
    %c0_i32_0 = arith.constant 0 : i32
    return %arg0, %c0_i32 : i32, i32
  }
  func.func @transform_2(%arg0: i32) -> (i32, i32) {
    %c0_i32 = arith.constant 0 : i32
    %c0_i32_0 = arith.constant 0 : i32
    return %arg0, %c0_i32 : i32, i32
  }
  func.func @transform_3(%arg0: i32) -> (i32, i32) {
    %c0_i32 = arith.constant 0 : i32
    %c0_i32_0 = arith.constant 0 : i32
    %c0_i32_1 = arith.constant 0 : i32
    return %c0_i32, %c0_i32_0 : i32, i32
  }
  func.func @transform_4(%arg0: i32) -> (i32, i32) {
    %c0_i32 = arith.constant 0 : i32
    %c0_i32_0 = arith.constant 0 : i32
    %c0_i32_1 = arith.constant 0 : i32
    return %c0_i32, %c0_i32_0 : i32, i32
  }
  func.func @transform_5(%arg0: i32) -> (i32, i32) {
    %c0_i32 = arith.constant 0 : i32
    %c0_i32_0 = arith.constant 0 : i32
    %c0_i32_1 = arith.constant 0 : i32
    return %c0_i32, %c0_i32_0 : i32, i32
  }
  func.func @transform_6(%arg0: i32) -> (i32, i32) {
    %c0_i32 = arith.constant 0 : i32
    %c0_i32_0 = arith.constant 0 : i32
    %c0_i32_1 = arith.constant 0 : i32
    return %c0_i32, %c0_i32_0 : i32, i32
  }
  func.func @transform_7(%arg0: i32) -> (i32, i32) {
    %c0_i32 = arith.constant 0 : i32
    %c0_i32_0 = arith.constant 0 : i32
    return %arg0, %c0_i32 : i32, i32
  }
  func.func @transform_8(%arg0: i32) -> (i32, i32, i32) {
    %c0_i32 = arith.constant 0 : i32
    %c0_i32_0 = arith.constant 0 : i32
    %c0_i32_1 = arith.constant 0 : i32
    return %arg0, %c0_i32, %c0_i32_0 : i32, i32, i32
  }
  func.func @transform_9(%arg0: i32) -> (i32, i32, i32) {
    %c0_i32 = arith.constant 0 : i32
    %c0_i32_0 = arith.constant 0 : i32
    %c0_i32_1 = arith.constant 0 : i32
    return %arg0, %c0_i32, %c0_i32_0 : i32, i32, i32
  }
}

</mosaic_0001>

<bundles_post_ra>
// kernel: tpu_custom_call.1
= control target key start
LH: loop header
LB: loop body
LE: loop exit
PB: predicated region body
PF: predicated region fallthrough
CT: control target
= control target key end

     0   :  { %15 = vsyncpa [#allocation3], 0  ;;  %s658_s0 = inlined_call_operand.vmem [shape: f32[16,32], index: 0, kind: input, shape index: {}]   ;;  %s659_s1 = inlined_call_operand.hbm [shape: f32[16,16], index: 1, kind: input, shape index: {}]   ;;  %s660_s2 = inlined_call_operand.vmem [shape: f32[16,3], index: 2, kind: input, shape index: {}]   ;;  %s661_s3 = inlined_call_operand.hbm [shape: f32[32,128], index: 3, kind: input, shape index: {}]   ;;  %s662_s4 = inlined_call_operand.hbm [shape: f32[16,128], index: 4, kind: input, shape index: {}]   ;;  %s663_s5 = inlined_call_operand.vmem [shape: f32[3,128], index: 5, kind: input, shape index: {}]   ;;  %s664_s6 = inlined_call_operand.vmem [shape: f32[1,128], index: 6, kind: input, shape index: {}]   ;;  %s665_s7 = inlined_call_operand.hbm [shape: f32[16,32], index: 7, kind: output, shape index: {0}]   ;;  %s666_s8 = inlined_call_operand.hbm [shape: f32[1,8,128], index: 8, kind: output, shape index: {1}]   ;;  %s667_s9 = inlined_call_operand.hbm [shape: f32[1,8,128], index: 9, kind: output, shape index: {2}]  }
   0x1   :  { %16 = vsyncpa [#allocation6], 0 }
   0x2   :  { %17 = vsyncpa [#allocation4], 0 }
   0x3   :  { %18 = vsyncpa [#allocation10], 0  ;;  %s40_s11 = sshll.u32 %s661_s3, 4  ;;  %s527_s12 = smov [#allocation5]   ;;  %s41_s11 = int_to_ptr.hbm [resolvable:$true] %s40_s11 }
   0x4   :  { %s42_s13 = sshll.u32 %s527_s12, 4  ;;  %s25_s16 = sshll.u32 %s659_s1, 4  ;;  %s43_s13 = int_to_ptr.vmem [resolvable:$true] %s42_s13  ;;  %s26_s16 = int_to_ptr.hbm [resolvable:$true] %s25_s16 }
   0x5   :  { %s528_s17 = smov 128   ;;  %s529_s18 = smov 8  }
   0x6   :  { %48 = dma.hbm_to_vmem [thread:$0]  %s41_s11, 512, %s43_s13, [#allocation6], %s528_s17, %s528_s17, %s529_s18  }
   0x7   :  { %s530_s19 = smov [#allocation2]   ;;  %s53_s3 = sshll.u32 %s662_s4, 4  ;;  %s54_s3 = int_to_ptr.hbm [resolvable:$true] %s53_s3 }
   0x8   :  { %s27_s20 = sshll.u32 %s530_s19, 4  ;;  %s531_s1 = smov [#allocation7]   ;;  %s28_s20 = int_to_ptr.vmem [resolvable:$true] %s27_s20 }
   0x9   :  { %33 = dma.hbm_to_vmem [thread:$0]  %s26_s16, 256, %s28_s20, [#allocation3], %s528_s17, %s528_s17, %s529_s18  }
   0xa   :  { %s55_s23 = sshll.u32 %s531_s1, 4  ;;  %s56_s23 = int_to_ptr.vmem [resolvable:$true] %s55_s23 }
   0xb   :  { %61 = dma.hbm_to_vmem [thread:$0]  %s54_s3, 256, %s56_s23, [#allocation6], %s528_s17, %s528_s17, %s529_s18  }
   0xc   :  { %519 = dma.done.wait [#allocation3], 256  }
   0xd   :  { %520 = vsyncadd [#allocation3], 4294967040 }
   0xe   :  { %521 = dma.done.wait [#allocation6], 768  }
   0xf   :  { %522 = vsyncadd [#allocation6], 4294966528  ;;  %vm158_vm0 = vcmask 1042432   ;;  %v83_v0 = vld [vmem:[#allocation5 + $0x18] sm:$0xff]  ;;  %v150_v1 = vld [vmem:[%s663_s5] sm:$0x7] }
  0x10   :  { %v148_v2 = vld [vmem:[%s660_s2] sm:$0xff]  ;;  %vm151_vm1 = vcmask 23552   ;;  %137 = vmatpush.msra.mxu1 %v83_v0  ;;  %347 = vmatpush.msra.mxu3 %v83_v0  ;;  %v87_v3 = vld [vmem:[#allocation7 + $0x8] sm:$0xff]  ;;  %v86_v5 = vld [vmem:[#allocation7] sm:$0xff]  ;;  %vm88_vm2 = vcmask 130048   ;;  %vm118_vm3 = vcmask 261120  }
  0x11   :  { %v82_v4 = vld [vmem:[#allocation5 + $0x10] sm:$0xff]  ;;  %342 = vmatpush.msk.msra.mxu2 %vm158_vm0, %v150_v1  ;;  %109 = vmatpush.msra.mxu0 %v87_v3  ;;  %v81_v6 = vld [vmem:[#allocation5 + $0x8] sm:$0xff]  ;;  %v80_v8 = vld [vmem:[#allocation5] sm:$0xff]  ;;  %s534_s12 = smov 96   ;;  %s535_s13 = smov [#allocation8]  }
  0x12   :  { %v84_v7 = vld [vmem:[#allocation2] sm:$0xff]  ;;  %343 = vmatmul.msk.f32.vlgmr.msra.gmra.mxu2 %vm151_vm1, %v148_v2  ;;  %138 = vmatpush.msra.mxu1 %v82_v4  ;;  %v79_v10 = vld [vmem:[%s658_s0 + $0x8] sm:$0xff]  ;;  %s291_s14 = sshll.u32 %s535_s13, 4  ;;  %s293_s19 = sshll.u32 %s665_s7, 4  ;;  %s292_s14 = int_to_ptr.vmem [resolvable:$true] %s291_s14  ;;  %s294_s19 = int_to_ptr.hbm [resolvable:$true] %s293_s19 }
  0x13   :  { %348 = vmatpush.msra.mxu3 %v82_v4  ;;  %110 = vmatpush.msra.mxu0 %v86_v5  ;;  %v78_v9 = vld [vmem:[%s658_s0] sm:$0xff]  ;;  %v149_v11 = vld [vmem:[%s660_s2 + $0x8] sm:$0xff]  ;;  %s532_s2 = smov 32   ;;  %s536_s7 = smov [#allocation9]  }
  0x14   :  { %139 = vmatpush.msra.mxu1 %v81_v6  ;;  %338 = vmatmul.msk.f32.vlgmr.msra.gmra.mxu0 %vm88_vm2, %v84_v7  ;;  %v85_v12 = vld [vmem:[#allocation2 + $0x8] sm:$0xff]  ;;  %v366_v17 = vld [vmem:[%s664_s6] ss:$0 sm:$0xff]  ;;  %s533_s6 = smov 64   ;;  %s305_s20 = sshll.u32 %s536_s7, 4  ;;  %s306_s20 = int_to_ptr.vmem [resolvable:$true] %s305_s20 }
  0x15   :  { %349 = vmatpush.msra.mxu3 %v81_v6  ;;  %s537_s3 = smov [#allocation11]   ;;  %s318_s24 = sshll.u32 %s667_s9, 4  ;;  %s319_s24 = int_to_ptr.hbm [resolvable:$true] %s318_s24 }
  0x16   :  { %140 = vmatpush.msra.mxu1 %v80_v8  ;;  %s316_s1 = sshll.u32 %s537_s3, 4  ;;  %s317_s1 = int_to_ptr.vmem [resolvable:$true] %s316_s1 }
  0x17   :  { %350 = vmatpush.msra.mxu3 %v80_v8  ;;  %340 = vmatmul.msk.f32.vlgmr.msra.gmra.mxu1 %vm118_vm3, %v78_v9 }
  0x18   :  { %341 = vmatmul.msk.f32.vlgmr.msra.gmra.mxu3 %vm118_vm3, %v79_v10 }
  0x1a   :  { %344 = vmatmul.msk.f32.gmra.mxu2 %vm151_vm1, %v149_v11 }
  0x1c   :  { %339 = vmatmul.msk.f32.gmra.mxu0 %vm88_vm2, %v85_v12 }
  0x91   :  { %v112_v13 = vpop.f32.mrf.mxu0 }
  0x94   :  { %v142_v14 = vpop.f32.mrf.mxu1 }
  0x95   :  { %v143_v15 = vadd.f32 %v142_v14, %v112_v13  ;;  %v179_v16 = vpop.f32.mrf.mxu2 }
  0x97   :  { %v185_v18 = vadd.f32 %v179_v16, %v143_v15 }
  0x99   :  { %v630_v19 = vadd.f32 %v366_v17, %v185_v18  ;;  %v115_v20 = vpop.f32.mrf.mxu0 }
  0x9b   :  { %v345_v21 = vmul.f32 -1.442695, %v630_v19  ;;  %v145_v22 = vpop.f32.mrf.mxu3 }
  0x9c   :  { %v146_v23 = vadd.f32 %v145_v22, %v115_v20 }
  0x9d   :  { %367 = vpow2.f32 %v345_v21  ;;  %v182_v24 = vpop.f32.mrf.mxu2 }
  0x9e   :  { %v186_v25 = vadd.f32 %v182_v24, %v146_v23 }
  0xa0   :  { %v633_v26 = vadd.f32 %v366_v17, %v186_v25 }
  0xa2   :  { %v346_v27 = vmul.f32 -1.442695, %v633_v26 }
  0xa3   :  { %v368_v28 = vpop.eup %367 }
  0xa4   :  { %v199_v29 = vadd.f32 1.0, %v368_v28  ;;  %369 = vpow2.f32 %v346_v27 }
  0xa6   :  { %371 = vrcp.f32 %v199_v29  ;;  %v212_v35 = vand.u32 2147483648, %v199_v29  ;;  %v210_v37 = vand.u32 2147483647, %v199_v29  ;;  %vm206_vm5 = vweird.f32 %v199_v29 }
  0xa8   :  { %v213_v40 = vor.u32 1.1754944e-38, %v212_v35  ;;  %vm211_vm7 = vcmp.eq.f32.partialorder %v210_v37, 8.507059e+37 }
  0xaa   :  { %v370_v30 = vpop.eup %369 }
  0xab   :  { %v200_v31 = vadd.f32 1.0, %v370_v30 }
  0xac   :  { %v372_v32 = vpop.eup %371 }
  0xad   :  { %373 = vrcp.f32 %v200_v31  ;;  %v202_v33 = vmul.f32 %v372_v32, %v199_v29  ;;  %vm207_vm4 = vweird.f32 %v372_v32  ;;  %v227_v46 = vand.u32 2147483648, %v200_v31 }
  0xae   :  { %vm208_vm6 = vmor %vm206_vm5, %vm207_vm4  ;;  %v225_v47 = vand.u32 2147483647, %v200_v31  ;;  %vm221_vm9 = vweird.f32 %v200_v31 }
  0xaf   :  { %v203_v34 = vsub.f32 1.0, %v202_v33  ;;  %v228_v50 = vor.u32 1.1754944e-38, %v227_v46 }
  0xb0   :  { %vm226_vm11 = vcmp.eq.f32.partialorder %v225_v47, 8.507059e+37 }
  0xb1   :  { %v204_v36 = vmul.f32 %v372_v32, %v203_v34 }
  0xb3   :  { %v374_v38 = vpop.eup %373  ;;  %v205_v39 = vadd.f32 %v372_v32, %v204_v36 }
  0xb4   :  { %v217_v41 = vmul.f32 %v374_v38, %v200_v31  ;;  %vm222_vm8 = vweird.f32 %v374_v38 }
  0xb5   :  { %v209_v42 = vsel %vm208_vm6, %v372_v32, %v205_v39  ;;  %vm223_vm10 = vmor %vm221_vm9, %vm222_vm8 }
  0xb6   :  { %v214_v43 = vsel %vm211_vm7, %v213_v40, %v209_v42  ;;  %v218_v44 = vsub.f32 1.0, %v217_v41 }
  0xb7   :  { %265 = vrot.lane.b32.xlu1 %v214_v43, %s532_s2  ;;  %233 = vrot.lane.b32.xlu0 %v214_v43, %s533_s6 }
  0xb8   :  { %v219_v45 = vmul.f32 %v374_v38, %v218_v44 }
  0xba   :  { %v220_v48 = vadd.f32 %v374_v38, %v219_v45 }
  0xbc   :  { %v224_v49 = vsel %vm223_vm10, %v374_v38, %v220_v48 }
  0xbd   :  { %v229_v51 = vsel %vm226_vm11, %v228_v50, %v224_v49 }
  0xbf   :  { %267 = vrot.lane.b32.xlu1 %v229_v51, %s532_s2  ;;  %235 = vrot.lane.b32.xlu0 %v229_v51, %s533_s6 }
 0x129   :  { %v234_v52 = vpop.permute.xlu0 %233  ;;  %v266_v54 = vpop.permute.xlu1 %265 }
 0x12a   :  { %v239_v53 = vmul.f32 %v234_v52, %v630_v19  ;;  %v253_v57 = vsel %vm118_vm3, %v234_v52, 0.0  ;;  %v271_v62 = vsel %vm118_vm3, %v266_v54, 0.0 }
 0x12c   :  { %243 = vrot.lane.b32.xlu0 %v239_v53, %s534_s12 }
 0x131   :  { %v236_v55 = vpop.permute.xlu0 %235  ;;  %v268_v60 = vpop.permute.xlu1 %267 }
 0x132   :  { %v240_v56 = vmul.f32 %v236_v55, %v633_v26  ;;  %v254_v58 = vsel %vm118_vm3, %v236_v55, 0.0  ;;  %v272_v61 = vsel %vm118_vm3, %v268_v60, 0.0 }
 0x133   :  { %v255_v59 = vadd.f32 %v254_v58, %v253_v57  ;;  %v273_v63 = vadd.f32 %v272_v61, %v271_v62 }
 0x134   :  { %245 = vrot.lane.b32.xlu1 %v240_v56, %s534_s12 }
 0x135   :  { %256 = vadd.xlane.f32.xlu2 %v255_v59 }
 0x13d   :  { %274 = vadd.xlane.f32.xlu2 %v273_v63 }
 0x19e   :  { %v244_v0 = vpop.permute.xlu0 %243 }
 0x19f   :  { %v249_v1 = vadd.f32 %v244_v0, %v630_v19 }
 0x1a1   :  { %251 = vst.msk [vmem:[#allocation8] sm:$0xff] %vm118_vm3, %v249_v1 }
 0x1a6   :  { %v246_v2 = vpop.permute.xlu1 %245 }
 0x1a7   :  { %v250_v3 = vadd.f32 %v246_v2, %v633_v26 }
 0x1a8   :  { %v257_v4 = vpop.xlane.xlu2 %256 }
 0x1a9   :  { %252 = vst.msk [vmem:[#allocation8 + $0x8] sm:$0xff] %vm118_vm3, %v250_v3  ;;  %v258_v5 = vrot.slane %v257_v4, 4 }
 0x1aa   :  { %299 = dma.vmem_to_hbm [thread:$0]  %s292_s14, 256, %s294_s19, [#allocation4], %s528_s17, %s528_s17, %s529_s18  }
 0x1ab   :  { %v259_v6 = vadd.f32 %v258_v5, %v257_v4  ;;  %s307_s17 = sshll.u32 %s666_s8, 4  ;;  %s308_s17 = int_to_ptr.hbm [resolvable:$true] %s307_s17 }
 0x1ad   :  { %v260_v7 = vrot.slane %v259_v6, 2 }
 0x1af   :  { %v261_v8 = vadd.f32 %v260_v7, %v259_v6 }
 0x1b0   :  { %v275_v9 = vpop.xlane.xlu2 %274 }
 0x1b1   :  { %v276_v10 = vrot.slane %v275_v9, 4  ;;  %v262_v11 = vrot.slane %v261_v8, 1 }
 0x1b3   :  { %v277_v12 = vadd.f32 %v276_v10, %v275_v9  ;;  %v263_v13 = vadd.f32 %v262_v11, %v261_v8 }
 0x1b5   :  { %v278_v14 = vrot.slane %v277_v12, 2  ;;  %351 = vpush %v263_v13 }
 0x1b7   :  { %v279_v15 = vadd.f32 %v278_v14, %v277_v12 }
 0x1b9   :  { %v280_v16 = vrot.slane %v279_v15, 1 }
 0x1bb   :  { %v281_v17 = vadd.f32 %v280_v16, %v279_v15 }
 0x1bd   :  { %353 = vpush %v281_v17 }
 0x1e6   :  { %s352_s18 = spop %351 }
 0x1e7   :  { %v283_v18 = vstv %s352_s18 }
 0x1e8   :  { %284 = vst [vmem:[#allocation9] sm:$0xff] %v283_v18 }
 0x1e9   :  { %310 = dma.vmem_to_hbm [thread:$0]  %s306_s20, 128, %s308_s17, [#allocation10]  }
 0x1ee   :  { %s354_s25 = spop %353 }
 0x1ef   :  { %v285_v19 = vstv %s354_s25 }
 0x1f0   :  { %286 = vst [vmem:[#allocation11] sm:$0xff] %v285_v19 }
 0x1f1   :  { %321 = dma.vmem_to_hbm [thread:$0]  %s317_s1, 128, %s319_s24, [#allocation10]  }
 0x1f2   :  { %523 = dma.done.wait [#allocation4], 256  }
 0x1f3   :  { %524 = vsyncadd [#allocation4], 4294967040 }
 0x1f4   :  { %525 = dma.done.wait [#allocation10], 256  }
 0x1f5   :  { %526 = vsyncadd [#allocation10], 4294967040 }
 0x1f6   :  { %334 = vsyncpa [#allocation3], 1 }
 0x1f7   :  { %335 = vsyncpa [#allocation6], 1 }
 0x1f8   :  { %336 = vsyncpa [#allocation4], 1 }
 0x1f9   :  { %337 = vsyncpa [#allocation10], 1 }

</bundles_post_ra>
